<compile_context>
chip_gen: v7x
topology: tpu7x:2x2x1
jax: 0.10.0
libtpu: 0.0.40
codegen_flags: <defaults>
</compile_context>

<pallas_src>
import functools

import jax
import jax.numpy as jnp
from jax.experimental import pallas as pl
from jax.experimental.pallas import tpu as pltpu

LANES = 128
SUBLANES = 8
_CHUNK_ELEMS = 256 * 1024  # ~1 MiB of f32 work per inner compute chunk


def _round_up(v, m):
    return ((v + m - 1) // m) * m


def _iou_loss_kernel(x_ref, t_ref, o_ref, acc_i_ref, acc_s_ref, *,
                     apply_sigmoid, chunk_rows, n_chunks, tail_rows):
    i = pl.program_id(0)
    last = pl.num_programs(0) - 1
    c_dim = x_ref.shape[-1]

    @pl.when(i == 0)
    def _init():
        acc_i_ref[...] = jnp.zeros_like(acc_i_ref)
        acc_s_ref[...] = jnp.zeros_like(acc_s_ref)

    def load_chunk(c):
        r0 = c * chunk_rows
        if chunk_rows % SUBLANES == 0:
            r0 = pl.multiple_of(r0, SUBLANES)
        x = x_ref[pl.ds(r0, chunk_rows), :].astype(jnp.float32)
        if apply_sigmoid:
            # PyTorch applies sigmoid only when input dtype is not float32.
            x = jax.nn.sigmoid(x)
        t = t_ref[pl.ds(r0, chunk_rows), :].astype(jnp.float32)
        return x, t

    def accumulate(x, t):
        # Full-rate (chunk_rows, C) accumulators: pure vadds in steady state;
        # the single cross-lane/sublane reduce happens in the finalize step.
        acc_i_ref[...] += x * t
        acc_s_ref[...] += x + t

    if tail_rows == 0:
        # All blocks fully valid: no masking anywhere.
        @pl.loop(0, n_chunks)
        def _steady(c):
            x, t = load_chunk(c)
            accumulate(x, t)
    else:
        @pl.when(i != last)
        def _steady_blocks():
            @pl.loop(0, n_chunks)
            def _(c):
                x, t = load_chunk(c)
                accumulate(x, t)

        @pl.when(i == last)
        def _ragged_block():
            # Only the ragged final block pays for the row mask; rows past
            # `tail_rows` are out-of-bounds garbage and are zeroed on BOTH
            # operands before the mul/add.
            n_tail_chunks = pl.cdiv(tail_rows, chunk_rows)  # static

            @pl.loop(0, n_tail_chunks)
            def _(c):
                x, t = load_chunk(c)
                row = jax.lax.broadcasted_iota(
                    jnp.int32, (chunk_rows, c_dim), 0)
                valid = (row + c * chunk_rows) < tail_rows
                accumulate(jnp.where(valid, x, 0.0),
                           jnp.where(valid, t, 0.0))

    @pl.when(i == last)
    def _finalize():
        smooth = jnp.float32(1e-5)
        inter = jnp.sum(acc_i_ref[...])
        union = jnp.sum(acc_s_ref[...]) - inter
        o_ref[0] = jnp.float32(1.0) - (inter + smooth) / (union + smooth)


def iou_loss_pallas(inp, target, *, block_rows=None):
    """Scalar IoU loss, semantics matching the PyTorch IoULoss.forward."""
    n = int(inp.size)
    assert int(target.size) == n, "input/target must have the same #elements"
    apply_sigmoid = (inp.dtype != jnp.float32)

    xf = jnp.ravel(inp)
    tf = jnp.ravel(target)

    # ---- free 2-D (rows, C) lane view (no data movement) -------------------
    if n % LANES == 0:
        c_dim = LANES
    else:
        c_last = int(inp.shape[-1]) if inp.ndim >= 1 else 1
        c_last_pad = _round_up(max(c_last, 1), LANES)
        if c_last > 1 and (c_last / c_last_pad) >= 0.5:
            # Full-extent minor blocks are legal for any C; the DMA only
            # touches real bytes, so no pad copy of either tensor is needed.
            c_dim = c_last
        else:
            # TODO(synk): element-granular in-kernel mask (flat index < n)
            # would avoid this copy for degenerate minor dims; this fallback
            # pads <128 elements whose values contribute exactly 0.
            pad = (-n) % LANES
            x_pad_val = -1e4 if apply_sigmoid else 0.0
            xf = jnp.pad(xf, (0, pad), constant_values=x_pad_val)
            tf = jnp.pad(tf, (0, pad), constant_values=0.0)
            n = n + pad
            c_dim = LANES
    rows = n // c_dim
    x2 = xf.reshape(rows, c_dim)
    t2 = tf.reshape(rows, c_dim)

    # ---- dtype-aware tile / chunk selection ---------------------------------
    c_pad = _round_up(c_dim, LANES)  # lanes actually occupied in VMEM
    chunk0 = max(SUBLANES, ((_CHUNK_ELEMS // c_pad) // SUBLANES) * SUBLANES)
    if block_rows is not None:
        chunk0 = min(chunk0,
                     max(SUBLANES, (int(block_rows) // SUBLANES) * SUBLANES))

    if rows <= chunk0:
        # Whole problem is a single compute chunk / single grid step.
        chunk_rows, n_chunks, block_r = rows, 1, rows
    else:
        chunk_rows = chunk0
        if block_rows is None:
            # ~8 MiB of HBM traffic (both inputs) per grid step.
            per_row_bytes = c_pad * (x2.dtype.itemsize + t2.dtype.itemsize)
            want_rows = max(chunk_rows, (8 * 1024 * 1024) // per_row_bytes)
            n_chunks = max(1, int(round(want_rows / chunk_rows)))
        else:
            n_chunks = max(1, int(block_rows) // chunk_rows)
        n_chunks = min(n_chunks, rows // chunk_rows)
        block_r = chunk_rows * n_chunks

    grid_steps = pl.cdiv(rows, block_r)
    tail_rows = rows % block_r  # 0 -> every block full, mask-free loop

    kernel = functools.partial(
        _iou_loss_kernel,
        apply_sigmoid=apply_sigmoid,
        chunk_rows=chunk_rows,
        n_chunks=n_chunks,
        tail_rows=tail_rows,
    )

    cost = pl.CostEstimate(
        flops=6 * n,
        transcendentals=(n if apply_sigmoid else 0),
        bytes_accessed=n * (x2.dtype.itemsize + t2.dtype.itemsize) + 4,
    )

    out = pl.pallas_call(
        kernel,
        out_shape=jax.ShapeDtypeStruct((1,), jnp.float32),
        grid_spec=pltpu.PrefetchScalarGridSpec(
            num_scalar_prefetch=0,
            grid=(grid_steps,),
            in_specs=[
                pl.BlockSpec((block_r, c_dim), lambda i: (i, 0)),
                pl.BlockSpec((block_r, c_dim), lambda i: (i, 0)),
            ],
            out_specs=pl.BlockSpec(memory_space=pltpu.MemorySpace.SMEM),
            scratch_shapes=[
                pltpu.VMEM((chunk_rows, c_dim), jnp.float32),  # x*t partials
                pltpu.VMEM((chunk_rows, c_dim), jnp.float32),  # x+t partials
            ],
        ),
        compiler_params=pltpu.CompilerParams(
            dimension_semantics=("arbitrary",),
            vmem_limit_bytes=32 * 1024 * 1024,
        ),
        cost_estimate=cost,
    )(x2, t2)
    return out[0]


def iou_loss_ref(inp, target):
    """Pure-JAX reference matching the PyTorch module."""
    smooth = 1e-5
    x = inp
    if x.dtype != jnp.float32:
        x = jax.nn.sigmoid(x)
    x = jnp.ravel(x).astype(jnp.float32)
    t = jnp.ravel(target).astype(jnp.float32)
    inter = jnp.sum(x * t)
    union = jnp.sum(x) + jnp.sum(t) - inter
    return 1.0 - (inter + smooth) / (union + smooth)


if __name__ == "__main__":
    key = jax.random.PRNGKey(0)
    k1, k2, k3, k4 = jax.random.split(key, 4)

    def check(x, t, rtol, atol, **kw):
        out = iou_loss_pallas(x, t, **kw)
        jax.block_until_ready(out)
        ref = iou_loss_ref(x, t)
        assert jnp.allclose(out, ref, rtol=rtol, atol=atol), (kw, out, ref)
        return out

    # 1) Primary small NCHW shape implied by the module's typical usage.
    B, Cc, H, W = 2, 4, 16, 16
    x = jax.random.uniform(k1, (B, Cc, H, W), dtype=jnp.float32)
    t = (jax.random.uniform(k2, (B, Cc, H, W)) > 0.5).astype(jnp.float32)
    check(x, t, 1e-5, 1e-6)

    # 2) bf16 logits -> sigmoid path (dtype != float32); bf16 stays bf16 in HBM.
    xb = jax.random.normal(k1, (B, Cc, H, W), dtype=jnp.bfloat16)
    check(xb, t.astype(jnp.bfloat16), 2e-2, 5e-3)

    # 3) Lane-unaligned element count: minor dim (131) becomes the lane view,
    #    no pad copy; single-block path.
    xu = jax.random.uniform(k3, (2, 4, 37, 131), dtype=jnp.float32)
    tu = (jax.random.uniform(k4, (2, 4, 37, 131)) > 0.5).astype(jnp.float32)
    check(xu, tu, 1e-4, 1e-5)

    # 4) Same tensors, forced small blocks -> multi-step grid + ragged tail.
    check(xu, tu, 1e-4, 1e-5, block_rows=64)

    # 5) Aligned, large enough for the multi-chunk inner loop + ragged tail.
    xl = jax.random.uniform(k1, (2, 4, 250, 256), dtype=jnp.float32)
    tl = (jax.random.uniform(k2, (2, 4, 250, 256)) > 0.5).astype(jnp.float32)
    check(xl, tl, 1e-4, 1e-5)

    # 6) bf16 sigmoid path through the gridded / ragged-tail code path.
    xlb = jax.random.normal(k3, (2, 4, 250, 256), dtype=jnp.bfloat16)
    check(xlb, tl.astype(jnp.bfloat16), 2e-2, 5e-3, block_rows=512)

    print("KERNEL_OK")
</pallas_src>

<mosaic_0001>
module attributes {stable_mosaic.version = 11 : i64} {
  func.func @_iou_loss_kernel(%arg0: i32, %arg1: memref<16x128xf32, #tpu.memory_space<vmem>>, %arg2: memref<16x128xf32, #tpu.memory_space<vmem>>, %arg3: memref<1xf32, #tpu.memory_space<smem>>, %arg4: memref<16x128xf32, #tpu.memory_space<vmem>>, %arg5: memref<16x128xf32, #tpu.memory_space<vmem>>) attributes {dimension_semantics = [#tpu.dimension_semantics<arbitrary>], iteration_bounds = array<i64: 1>, scalar_prefetch = 0 : i64, scratch_operands = 2 : i64, tpu.core_type = #tpu.core_type<tc>, window_params = [{transform_indices = @transform_0, window_bounds = array<i64: 16, 128>}, {transform_indices = @transform_1, window_bounds = array<i64: 16, 128>}, {transform_indices = @transform_2, window_bounds = array<i64: 1>}]} {
    %c0_i32 = arith.constant 0 : i32
    %0 = arith.cmpi eq, %arg0, %c0_i32 : i32
    %1 = arith.extui %0 : i1 to i32
    %c0_i32_0 = arith.constant 0 : i32
    %2 = arith.cmpi ne, %1, %c0_i32_0 : i32
    scf.if %2 {
      %cst = arith.constant 0.000000e+00 : f32
      %22 = vector.broadcast %cst : f32 to vector<16x128xf32>
      %c0_15 = arith.constant 0 : index
      %c0_16 = arith.constant 0 : index
      %23 = vector.load %arg4[%c0_15, %c0_16] : memref<16x128xf32, #tpu.memory_space<vmem>>, vector<16x128xf32>
      tpu.vector_store %arg4[%c0_15, %c0_16], %22 {strides = array<i32>} : memref<16x128xf32, #tpu.memory_space<vmem>>, vector<16x128xf32>,
      %cst_17 = arith.constant 0.000000e+00 : f32
      %24 = vector.broadcast %cst_17 : f32 to vector<16x128xf32>
      %c0_18 = arith.constant 0 : index
      %c0_19 = arith.constant 0 : index
      %25 = vector.load %arg5[%c0_18, %c0_19] : memref<16x128xf32, #tpu.memory_space<vmem>>, vector<16x128xf32>
      tpu.vector_store %arg5[%c0_18, %c0_19], %24 {strides = array<i32>} : memref<16x128xf32, #tpu.memory_space<vmem>>, vector<16x128xf32>,
    } else {
    }
    %c0_i32_1 = arith.constant 0 : i32
    %c1_i32 = arith.constant 1 : i32
    %3 = arith.muli %c0_i32_1, %c1_i32 : i32
    %c0_i32_2 = arith.constant 0 : i32
    %4 = arith.addi %c0_i32_2, %3 : i32
    %c16_i32 = arith.constant 16 : i32
    %5 = arith.muli %4, %c16_i32 : i32
    %6 = tpu.assume_multiple %5, 8 : i32
    %7 = arith.index_cast %6 : i32 to index
    %c0 = arith.constant 0 : index
    %8 = vector.load %arg1[%7, %c0] : memref<16x128xf32, #tpu.memory_space<vmem>>, vector<16x128xf32>
    %9 = arith.index_cast %6 : i32 to index
    %c0_3 = arith.constant 0 : index
    %10 = vector.load %arg2[%9, %c0_3] : memref<16x128xf32, #tpu.memory_space<vmem>>, vector<16x128xf32>
    %c0_4 = arith.constant 0 : index
    %c0_5 = arith.constant 0 : index
    %11 = vector.load %arg4[%c0_4, %c0_5] : memref<16x128xf32, #tpu.memory_space<vmem>>, vector<16x128xf32>
    %12 = arith.mulf %8, %10 : vector<16x128xf32>
    %13 = arith.addf %11, %12 : vector<16x128xf32>
    %c0_6 = arith.constant 0 : index
    %c0_7 = arith.constant 0 : index
    %14 = vector.load %arg4[%c0_6, %c0_7] : memref<16x128xf32, #tpu.memory_space<vmem>>, vector<16x128xf32>
    tpu.vector_store %arg4[%c0_6, %c0_7], %13 {strides = array<i32>} : memref<16x128xf32, #tpu.memory_space<vmem>>, vector<16x128xf32>,
    %c0_8 = arith.constant 0 : index
    %c0_9 = arith.constant 0 : index
    %15 = vector.load %arg5[%c0_8, %c0_9] : memref<16x128xf32, #tpu.memory_space<vmem>>, vector<16x128xf32>
    %16 = arith.addf %8, %10 : vector<16x128xf32>
    %17 = arith.addf %15, %16 : vector<16x128xf32>
    %c0_10 = arith.constant 0 : index
    %c0_11 = arith.constant 0 : index
    %18 = vector.load %arg5[%c0_10, %c0_11] : memref<16x128xf32, #tpu.memory_space<vmem>>, vector<16x128xf32>
    tpu.vector_store %arg5[%c0_10, %c0_11], %17 {strides = array<i32>} : memref<16x128xf32, #tpu.memory_space<vmem>>, vector<16x128xf32>,
    %c1_i32_12 = arith.constant 1 : i32
    %c0_i32_13 = arith.constant 0 : i32
    %19 = arith.cmpi eq, %arg0, %c0_i32_13 : i32
    %20 = arith.extui %19 : i1 to i32
    %c0_i32_14 = arith.constant 0 : i32
    %21 = arith.cmpi ne, %20, %c0_i32_14 : i32
    scf.if %21 {
      %c0_15 = arith.constant 0 : index
      %c0_16 = arith.constant 0 : index
      %22 = vector.load %arg4[%c0_15, %c0_16] : memref<16x128xf32, #tpu.memory_space<vmem>>, vector<16x128xf32>
      %23 = vector.shape_cast %22 : vector<16x128xf32> to vector<1x16x128xf32>
      %cst = arith.constant dense<0.000000e+00> : vector<1xf32>
      %24 = vector.multi_reduction <add>, %23, %cst [1, 2] : vector<1x16x128xf32> to vector<1xf32>
      %25 = vector.shape_cast %24 : vector<1xf32> to vector<1x1x1xf32>
      %26 = vector.extract %25[0, 0, 0] : f32 from vector<1x1x1xf32>
      %c0_17 = arith.constant 0 : index
      %c0_18 = arith.constant 0 : index
      %27 = vector.load %arg5[%c0_17, %c0_18] : memref<16x128xf32, #tpu.memory_space<vmem>>, vector<16x128xf32>
      %28 = vector.shape_cast %27 : vector<16x128xf32> to vector<1x16x128xf32>
      %cst_19 = arith.constant dense<0.000000e+00> : vector<1xf32>
      %29 = vector.multi_reduction <add>, %28, %cst_19 [1, 2] : vector<1x16x128xf32> to vector<1xf32>
      %30 = vector.shape_cast %29 : vector<1xf32> to vector<1x1x1xf32>
      %31 = vector.extract %30[0, 0, 0] : f32 from vector<1x1x1xf32>
      %32 = arith.subf %31, %26 : f32
      %cst_20 = arith.constant 9.99999974E-6 : f32
      %33 = arith.addf %26, %cst_20 : f32
      %cst_21 = arith.constant 9.99999974E-6 : f32
      %34 = arith.addf %32, %cst_21 : f32
      %35 = arith.divf %33, %34 : f32
      %cst_22 = arith.constant 1.000000e+00 : f32
      %36 = arith.subf %cst_22, %35 : f32
      %c0_23 = arith.constant 0 : index
      %37 = memref.load %arg3[%c0_23] : memref<1xf32, #tpu.memory_space<smem>>
      memref.store %36, %arg3[%c0_23] : memref<1xf32, #tpu.memory_space<smem>>
    } else {
    }
    return
  }
  func.func @transform_0(%arg0: i32) -> (i32, i32) {
    %c0_i32 = arith.constant 0 : i32
    %c0_i32_0 = arith.constant 0 : i32
    return %arg0, %c0_i32 : i32, i32
  }
  func.func @transform_1(%arg0: i32) -> (i32, i32) {
    %c0_i32 = arith.constant 0 : i32
    %c0_i32_0 = arith.constant 0 : i32
    return %arg0, %c0_i32 : i32, i32
  }
  func.func @transform_2(%arg0: i32) -> i32 {
    %c0_i32 = arith.constant 0 : i32
    %c0_i32_0 = arith.constant 0 : i32
    return %c0_i32 : i32
  }
}

</mosaic_0001>

<bundles_post_ra>
// kernel: tpu_custom_call.1
= control target key start
LH: loop header
LB: loop body
LE: loop exit
PB: predicated region body
PF: predicated region fallthrough
CT: control target
= control target key end

     0   :  { %7 = vsyncpa [#allocation5], 0  ;;  %s249_s0 = inlined_call_operand.hbm [shape: f32[16,128], index: 0, kind: input, shape index: {}]   ;;  %s250_s1 = inlined_call_operand.hbm [shape: f32[16,128], index: 1, kind: input, shape index: {}]   ;;  %s251_s2 = inlined_call_operand.hbm [shape: f32[1], index: 2, kind: output, shape index: {}]  }
   0x1   :  { %8 = vsyncpa [#allocation8], 0 }
   0x2   :  { %9 = vsyncpa [#allocation6], 0  ;;  %s193_s9 = smov [#allocation4]   ;;  %s133_s13 = scalar_lea.hbm %s249_s0, 256 }
   0x3   :  { %s15_s10 = sshll.u32 %s193_s9, 4  ;;  %p134_p0 = scmp.ne.s32.totalorder %s249_s0, %s133_s13  ;;  %s16_s10 = int_to_ptr.vmem [resolvable:$true] %s15_s10 }
   0x4   :  { %p137_p1 = scmp.lt.u32.totalorder %s133_s13, %s249_s0 }
   0x6   :  { %p139_p2 = pnand %p137_p1, %p134_p0 }
   0x8   :  { %142 = shalt.err (!%p139_p2)
}
   0x9   :  { %s143_s18 = scalar_lea.vmem %s16_s10, 256  ;;  %p148_p4 = scmp.lt.s32.totalorder %s16_s10, %s16_s10 }
   0xa   :  { %p144_p3 = scmp.ne.s32.totalorder %s16_s10, %s143_s18  ;;  %p149_p5 = scmp.lt.s32.totalorder %s143_s18, %s143_s18 }
   0xc   :  { %p150_p6 = por %p149_p5, %p148_p4 }
   0xe   :  { %p151_p7 = pnand %p150_p6, %p144_p3 }
  0x10   :  { %154 = shalt.err (!%p151_p7)
}
  0x11   :  { %s194_s19 = smov 128   ;;  %s195_s20 = smov 8  }
  0x12   :  { %21 = dma.hbm_to_vmem [thread:$0]  %s249_s0, 256, %s16_s10, [#allocation5], %s194_s19, %s194_s19, %s195_s20  }
  0x13   :  { %s196_s23 = smov [#allocation7]   ;;  %s155_s27 = scalar_lea.hbm %s250_s1, 256 }
  0x14   :  { %s27_s24 = sshll.u32 %s196_s23, 4  ;;  %p156_p8 = scmp.ne.s32.totalorder %s250_s1, %s155_s27  ;;  %s28_s24 = int_to_ptr.vmem [resolvable:$true] %s27_s24 }
  0x15   :  { %p159_p9 = scmp.lt.u32.totalorder %s155_s27, %s250_s1 }
  0x17   :  { %p161_p10 = pnand %p159_p9, %p156_p8 }
  0x19   :  { %164 = shalt.err (!%p161_p10)
}
  0x1a   :  { %s165_s4 = scalar_lea.vmem %s28_s24, 256  ;;  %p170_p12 = scmp.lt.s32.totalorder %s28_s24, %s28_s24 }
  0x1b   :  { %p166_p11 = scmp.ne.s32.totalorder %s28_s24, %s165_s4  ;;  %p171_p13 = scmp.lt.s32.totalorder %s165_s4, %s165_s4 }
  0x1d   :  { %p172_p0 = por %p171_p13, %p170_p12 }
  0x1f   :  { %p173_p1 = pnand %p172_p0, %p166_p11 }
  0x21   :  { %176 = shalt.err (!%p173_p1)
}
  0x22   :  { %33 = dma.hbm_to_vmem [thread:$0]  %s250_s1, 256, %s28_s24, [#allocation8], %s194_s19, %s194_s19, %s195_s20  }
  0x23   :  { %187 = dma.done.wait [#allocation5], 256  }
  0x24   :  { %188 = vsyncadd [#allocation5], 4294967040 }
  0x25   :  { %189 = dma.done.wait [#allocation8], 256  }
  0x26   :  { %190 = vsyncadd [#allocation8], 4294967040  ;;  %v48_v0 = vld [vmem:[#allocation4] sm:$0xff]  ;;  %v49_v1 = vld [vmem:[#allocation4 + $0x8] sm:$0xff]  ;;  %s177_s15 = scalar_lea.hbm %s251_s2, 16 }
  0x27   :  { %v50_v2 = vld [vmem:[#allocation7] sm:$0xff]  ;;  %v51_v3 = vld [vmem:[#allocation7 + $0x8] sm:$0xff]  ;;  %p178_p2 = scmp.ne.s32.totalorder %s251_s2, %s177_s15  ;;  %p181_p3 = scmp.lt.u32.totalorder %s177_s15, %s251_s2 }
  0x28   :  { %v54_v4 = vmul.f32 %v50_v2, %v48_v0  ;;  %v55_v5 = vmul.f32 %v51_v3, %v49_v1  ;;  %v62_v6 = vadd.f32 %v50_v2, %v48_v0  ;;  %v63_v7 = vadd.f32 %v51_v3, %v49_v1 }
  0x29   :  { %p183_p4 = pnand %p181_p3, %p178_p2 }
  0x2a   :  { %v73_v8 = vadd.f32 %v55_v5, %v54_v4  ;;  %v85_v9 = vadd.f32 %v63_v7, %v62_v6 }
  0x2c   :  { %74 = vadd.xlane.f32.xlu0 %v73_v8 }
  0x30   :  { %86 = vadd.xlane.f32.xlu0 %v85_v9 }
  0xb9   :  { %v75_v10 = vpop.xlane.xlu0 %74 }
  0xba   :  { %v76_v11 = vrot.slane %v75_v10, 4 }
  0xbc   :  { %v77_v12 = vadd.f32 %v76_v11, %v75_v10 }
  0xbd   :  { %v87_v13 = vpop.xlane.xlu0 %86 }
  0xbe   :  { %v78_v14 = vrot.slane %v77_v12, 2  ;;  %v88_v15 = vrot.slane %v87_v13, 4 }
  0xc0   :  { %v89_v16 = vadd.f32 %v88_v15, %v87_v13  ;;  %v79_v17 = vadd.f32 %v78_v14, %v77_v12 }
  0xc2   :  { %v90_v18 = vrot.slane %v89_v16, 2  ;;  %v80_v19 = vrot.slane %v79_v17, 1 }
  0xc4   :  { %v91_v20 = vadd.f32 %v90_v18, %v89_v16  ;;  %v81_v21 = vadd.f32 %v80_v19, %v79_v17 }
  0xc6   :  { %120 = vpush %v81_v21  ;;  %v92_v22 = vrot.slane %v91_v20, 1 }
  0xc8   :  { %v93_v23 = vadd.f32 %v92_v22, %v91_v20 }
  0xca   :  { %122 = vpush %v93_v23 }
  0xf7   :  { %s121_s1 = spop %120 }
  0xf8   :  { %s96_s9 = sadd.f32 1e-05, %s121_s1 }
  0xfb   :  { %s123_s6 = spop %122 }
  0xfc   :  { %s95_s7 = ssub.f32 %s123_s6, %s121_s1 }
  0xfe   :  { %s97_s8 = sadd.f32 1e-05, %s95_s7 }
 0x100   :  { %v98_v24 = vstv %s97_s8 }
 0x101   :  { %131 = vrcp.f32 %v98_v24 }
 0x10b   :  { %v132_v25 = vpop.eup %131 }
 0x10c   :  { %124 = vpush %v132_v25 }
 0x13d   :  { %s125_s10 = spop %124 }
 0x13e   :  { %s101_s11 = smul.f32 %s125_s10, %s96_s9 }
 0x140   :  { %s102_s12 = ssub.f32 1.0, %s101_s11 }
 0x142   :  { %104 = sst [smem:[#allocation9]] %s102_s12 }
 0x143   :  { %186 = shalt.err (!%p183_p4)
}
 0x144   :  { %s197_s20 = smov [#allocation9]  }
 0x145   :  { %112 = dma.smem_to_hbm %s197_s20, 16, %s251_s2, [#allocation6]  }
 0x146   :  { %191 = dma.done.wait [#allocation6], 16  }
 0x147   :  { %192 = vsyncadd [#allocation6], 4294967280 }
 0x148   :  { %116 = sfence }
 0x149   :  { %117 = vsyncpa [#allocation5], 1 }
 0x14a   :  { %118 = vsyncpa [#allocation8], 1 }
 0x14b   :  { %119 = vsyncpa [#allocation6], 1 }

</bundles_post_ra>
